<compile_context>
chip_gen: v6e
topology: v6e:2x2x1
jax: 0.10.0
libtpu: 0.0.40
codegen_flags: <defaults>
</compile_context>

<pallas_src>
import functools

import jax
import jax.numpy as jnp
from jax.experimental import pallas as pl
from jax.experimental.pallas import tpu as pltpu

IGNORE_INDEX = -100
_NEG_BIG = -1e30


def _round_up(x, m):
    return (x + m - 1) // m * m


def _vmem_capacity_bytes():
    """Per-core VMEM capacity, with a conservative (v7x-sized) fallback."""
    try:
        info = pltpu.get_tpu_info()
        for name in ("vmem_capacity_bytes", "vmem_bytes", "vmem_size_bytes"):
            cap = getattr(info, name, None)
            if cap:
                return int(cap)
    except Exception:
        pass
    return 64 * 1024 * 1024


def _online_update(m_ref, l_ref, z):
    """Flash-style running (max, sum-exp) update over the lane axis of z."""
    m_old = m_ref[...]
    m_new = jnp.maximum(m_old, jnp.max(z, axis=-1, keepdims=True))
    l_ref[...] = l_ref[...] * jnp.exp(m_old - m_new) + jnp.sum(
        jnp.exp(z - m_new), axis=-1, keepdims=True)
    m_ref[...] = m_new


def _jsd_lm_head_kernel(tgt_ref, xs_ref, xt_ref, ws_ref, wt_ref, bs_ref, bt_ref,
                        out_ref,
                        m_s, l_s, m_t, l_t, m_u, l_u, picked, jsd_acc,
                        *, beta, inv_t, temp_is_one, ignore_index,
                        n_rows, v_orig, block_v, mask_cols, row_pad):
    i = pl.program_id(0)     # row tile
    ph = pl.program_id(1)    # 0: online-LSE pass, 1: JSD/CE pass
    k = pl.program_id(2)     # vocab tile
    nv = pl.num_programs(2)

    # ---- fused LM heads for this (row tile, vocab tile) ----------------------------
    # Weights are (tv, H_in) blocks of the untransposed (V, H_in) matrices; contract on
    # the last dim of both operands (transposed-RHS matmul -> MXU), f32 accumulation.
    dn = (((1,), (1,)), ((), ()))
    s = jax.lax.dot_general(xs_ref[...], ws_ref[...], dn,
                            preferred_element_type=jnp.float32) + bs_ref[...]
    t = jax.lax.dot_general(xt_ref[...], wt_ref[...], dn,
                            preferred_element_type=jnp.float32) + bt_ref[...]

    tm = s.shape[0]
    col = None
    if mask_cols:
        # Only built when the vocab is padded; padded columns are forced to -inf-ish so
        # they contribute exp() == 0 everywhere below.
        col = k * block_v + jax.lax.broadcasted_iota(jnp.int32, s.shape, 1)
        col_valid = col < v_orig
        s = jnp.where(col_valid, s, _NEG_BIG)
        t = jnp.where(col_valid, t, _NEG_BIG)

    @pl.when(jnp.logical_and(ph == 0, k == 0))
    def _init():
        neg_inf = jnp.full(m_s.shape, -jnp.inf, jnp.float32)
        zeros = jnp.zeros(l_s.shape, jnp.float32)
        m_s[...] = neg_inf
        l_s[...] = zeros
        m_t[...] = neg_inf
        l_t[...] = zeros
        m_u[...] = neg_inf
        l_u[...] = zeros
        picked[...] = zeros
        jsd_acc[...] = zeros

    @pl.when(ph == 0)
    def _pass_lse():
        ss = s if temp_is_one else s * inv_t
        tt = t if temp_is_one else t * inv_t
        _online_update(m_s, l_s, ss)
        _online_update(m_t, l_t, tt)
        if not temp_is_one:
            _online_update(m_u, l_u, s)   # unscaled student LSE for the hard CE loss
        c = col if col is not None else (
            k * block_v + jax.lax.broadcasted_iota(jnp.int32, s.shape, 1))
        tgt = tgt_ref[...]
        picked[...] += jnp.sum(jnp.where(c == tgt, s, 0.0), axis=-1, keepdims=True)

    @pl.when(jnp.logical_and(ph == 1, k == 0))
    def _finalize_lse():
        m_s[...] = m_s[...] + jnp.log(l_s[...])
        m_t[...] = m_t[...] + jnp.log(l_t[...])
        if not temp_is_one:
            m_u[...] = m_u[...] + jnp.log(l_u[...])

    @pl.when(ph == 1)
    def _pass_jsd():
        ss = s if temp_is_one else s * inv_t
        tt = t if temp_is_one else t * inv_t
        slp = ss - m_s[...]
        tlp = tt - m_t[...]
        sp = jnp.exp(slp)
        tp = jnp.exp(tlp)
        log_mix = jnp.log((1.0 - beta) * sp + beta * tp)
        # Single weighted accumulator: beta*teacher_kl + (1-beta)*student_kl.
        # The where-guards avoid 0 * (-inf) -> NaN when a prob fully underflows
        # (TPU select does not propagate NaN from the discarded lane).
        contrib = (jnp.where(sp > 0.0, ((1.0 - beta) * sp) * (slp - log_mix), 0.0)
                   + jnp.where(tp > 0.0, (beta * tp) * (tlp - log_mix), 0.0))
        jsd_acc[...] += jnp.sum(contrib, axis=-1, keepdims=True)

    @pl.when(jnp.logical_and(ph == 1, k == nv - 1))
    def _emit():
        tgt = tgt_ref[...]
        valid = tgt != ignore_index
        lse_ce = m_s[...] if temp_is_one else m_u[...]
        ce_row = jnp.where(valid, lse_ce - picked[...], 0.0)
        jsd_row = jsd_acc[...]
        if row_pad:
            rid = i * tm + jax.lax.broadcasted_iota(jnp.int32, (tm, 1), 0)
            row_valid = rid < n_rows
            jsd_row = jnp.where(row_valid, jsd_row, 0.0)
        ce_sum = jnp.sum(ce_row)
        jsd_sum = jnp.sum(jsd_row)
        lane = jax.lax.broadcasted_iota(jnp.int32, out_ref.shape, 2)
        out_ref[...] = jnp.where(lane == 0, ce_sum,
                                 jnp.where(lane == 1, jsd_sum, 0.0))


def lm_head_jsd_loss(student_input, teacher_input, target, ws, wt, bs, bt, *,
                     beta=0.5, temperature=1.0, weight_hard_loss=0.5,
                     weight_soft_loss=0.5, ignore_index=IGNORE_INDEX,
                     block_rows=256, block_v=1024, use_bf16=True):
    BT, Hs = student_input.shape
    BT_t, H = teacher_input.shape
    assert BT == BT_t
    V, Hs_w = ws.shape
    assert Hs_w == Hs and wt.shape == (V, H)

    cdt = jnp.bfloat16 if use_bf16 else jnp.float32
    c_bytes = 2 if use_bf16 else 4
    row_align = 16 if use_bf16 else 8

    # ---- row tile: big for MXU/weight-reuse, but keep >= 2 row tiles when possible so
    # the "parallel" row axis can feed both TensorCores on dual-TC chips (v7x).
    tm = min(block_rows, _round_up(BT, row_align))
    if _round_up(BT, tm) // tm < 2 and tm >= 2 * row_align:
        tm = _round_up((BT + 1) // 2, row_align)

    # ---- vocab tile ----
    tv = _round_up(min(block_v, V), 128)

    # ---- fit the tiles to the on-chip VMEM budget (v7x has only 64 MiB / core) ------
    budget = int(0.75 * _vmem_capacity_bytes())

    def vmem_estimate(tm_, tv_):
        w = 2 * (Hs + H) * tv_ * c_bytes            # double-buffered weight tiles
        a = 2 * tm_ * (Hs + H) * c_bytes            # double-buffered activation tiles
        misc = 2 * 2 * max(tv_, 128) * 4            # bias tiles
        misc += 2 * tm_ * 128 * 4                   # target tiles (lane-padded)
        misc += 2 * 8 * 128 * 4                     # output block
        sc = 8 * tm_ * 128 * 4                      # per-row stat scratch (lane-padded)
        tmp = 10 * tm_ * tv_ * 4                    # (tm, tv) f32 temporaries (estimate)
        return w + a + misc + sc + tmp

    while vmem_estimate(tm, tv) > budget:
        if tv > 128:
            tv = max(128, (tv // 2) // 128 * 128)
        elif tm > row_align:
            tm = max(row_align, (tm // 2) // row_align * row_align)
        else:
            break

    BT_pad = _round_up(BT, tm)
    V_pad = _round_up(V, tv)
    n_row_tiles = BT_pad // tm
    n_v_tiles = V_pad // tv

    vmem_limit = int(min(budget, max(int(vmem_estimate(tm, tv) * 1.25),
                                     32 * 1024 * 1024)))

    # ---- data prep (no weight transposes; pad only if needed) -----------------------
    def pad_rows(x):
        return jnp.pad(x, ((0, BT_pad - BT), (0, 0))) if BT_pad != BT else x

    def pad_vocab_rows(w):  # (V, H_in) -> (V_pad, H_in)
        return jnp.pad(w, ((0, V_pad - V), (0, 0))) if V_pad != V else w

    xs = pad_rows(jnp.asarray(student_input).astype(cdt))
    xt = pad_rows(jnp.asarray(teacher_input).astype(cdt))
    ws_p = pad_vocab_rows(jnp.asarray(ws).astype(cdt))       # (V_pad, Hs)
    wt_p = pad_vocab_rows(jnp.asarray(wt).astype(cdt))       # (V_pad, H)
    bs2 = jnp.pad(jnp.asarray(bs, jnp.float32), (0, V_pad - V)).reshape(1, V_pad)
    bt2 = jnp.pad(jnp.asarray(bt, jnp.float32), (0, V_pad - V)).reshape(1, V_pad)

    tgt = jnp.asarray(target, jnp.int32)
    tgt_pad = (jnp.pad(tgt, (0, BT_pad - BT), constant_values=ignore_index)
               if BT_pad != BT else tgt)
    tgt2 = tgt_pad.reshape(BT_pad, 1)

    temp_is_one = float(temperature) == 1.0
    kernel = functools.partial(
        _jsd_lm_head_kernel,
        beta=float(beta), inv_t=float(1.0 / temperature), temp_is_one=temp_is_one,
        ignore_index=int(ignore_index), n_rows=int(BT), v_orig=int(V),
        block_v=int(tv), mask_cols=(V_pad != V), row_pad=(BT_pad != BT))

    # Per-row running stats: m_s, l_s, m_t, l_t, m_u, l_u, picked, jsd_acc.
    # (Kept as separate (tm, 1) buffers for clarity; packing them into one (tm, 8)
    #  buffer is a small VMEM win only.)
    scratch = [pltpu.VMEM((tm, 1), jnp.float32) for _ in range(8)]

    partials = pl.pallas_call(
        kernel,
        out_shape=jax.ShapeDtypeStruct((n_row_tiles, 8, 128), jnp.float32),
        grid_spec=pltpu.PrefetchScalarGridSpec(
            num_scalar_prefetch=0,
            grid=(n_row_tiles, 2, n_v_tiles),
            in_specs=[
                pl.BlockSpec((tm, 1), lambda i, p, k: (i, 0)),    # targets
                pl.BlockSpec((tm, Hs), lambda i, p, k: (i, 0)),   # student activations
                pl.BlockSpec((tm, H), lambda i, p, k: (i, 0)),    # teacher activations
                pl.BlockSpec((tv, Hs), lambda i, p, k: (k, 0)),   # student weight tile
                pl.BlockSpec((tv, H), lambda i, p, k: (k, 0)),    # teacher weight tile
                pl.BlockSpec((1, tv), lambda i, p, k: (0, k)),    # student bias tile
                pl.BlockSpec((1, tv), lambda i, p, k: (0, k)),    # teacher bias tile
            ],
            out_specs=pl.BlockSpec((1, 8, 128), lambda i, p, k: (i, 0, 0)),
            scratch_shapes=scratch,
        ),
        compiler_params=pltpu.CompilerParams(
            dimension_semantics=("parallel", "arbitrary", "arbitrary"),
            vmem_limit_bytes=vmem_limit),
    )(tgt2, xs, xt, ws_p, wt_p, bs2, bt2)

    ce_sum = jnp.sum(partials[:, 0, 0])
    jsd_sum = jnp.sum(partials[:, 0, 1])

    # Hard CE over non-ignored rows; soft JSD over all rows / BT (matches _reference).
    n_valid = jnp.sum((tgt != ignore_index).astype(jnp.float32))
    hard = jnp.where(n_valid > 0, ce_sum / jnp.maximum(n_valid, 1.0), 0.0)
    soft = jsd_sum / float(BT)
    return weight_hard_loss * hard + weight_soft_loss * soft


def _reference(xs, xt, tgt, ws, wt, bs, bt, *, beta, temperature, wh, wsoft, ignore):
    s_logits = (xs @ ws.T + bs).astype(jnp.float32)
    t_logits = (xt @ wt.T + bt).astype(jnp.float32)
    valid = tgt != ignore
    lse = jax.scipy.special.logsumexp(s_logits, axis=-1)
    safe_tgt = jnp.where(valid, tgt, 0)
    picked = jnp.take_along_axis(s_logits, safe_tgt[:, None], axis=-1)[:, 0]
    hard = jnp.sum(jnp.where(valid, lse - picked, 0.0)) / jnp.sum(valid)
    s = s_logits / temperature
    t = t_logits / temperature
    slp = jax.nn.log_softmax(s, -1)
    tlp = jax.nn.log_softmax(t, -1)
    sp, tp = jnp.exp(slp), jnp.exp(tlp)
    lm = jnp.log((1 - beta) * sp + beta * tp)
    n = xs.shape[0]
    skl = jnp.sum(sp * (slp - lm)) / n
    tkl = jnp.sum(tp * (tlp - lm)) / n
    soft = beta * tkl + (1 - beta) * skl
    return wh * hard + wsoft * soft


if __name__ == "__main__":
    key = jax.random.PRNGKey(0)

    def make_case(kk, BT, H, V):
        Hs = H // 2
        ks = jax.random.split(kk, 7)
        xs = jax.random.normal(ks[0], (BT, Hs), jnp.float32) * 0.5
        xt = jax.random.normal(ks[1], (BT, H), jnp.float32) * 0.5
        # torch.nn.Linear default-style init: U(-1/sqrt(fan_in), 1/sqrt(fan_in))
        ws = jax.random.uniform(ks[2], (V, Hs), jnp.float32, -1.0 / Hs ** 0.5, 1.0 / Hs ** 0.5)
        wt = jax.random.uniform(ks[3], (V, H), jnp.float32, -1.0 / H ** 0.5, 1.0 / H ** 0.5)
        bs = jax.random.uniform(ks[4], (V,), jnp.float32, -1.0 / Hs ** 0.5, 1.0 / Hs ** 0.5)
        bt = jax.random.uniform(ks[5], (V,), jnp.float32, -1.0 / H ** 0.5, 1.0 / H ** 0.5)
        tgt = jax.random.randint(ks[6], (BT,), 0, V, jnp.int32)
        tgt = tgt.at[1].set(IGNORE_INDEX).at[BT - 2].set(IGNORE_INDEX)
        return xs, xt, tgt, ws, wt, bs, bt

    k_a, k_b = jax.random.split(key)
    # Case A: B=2, T=8 -> BT=16 tokens, H=64 (student H//2=32), V=256.
    case_a = make_case(k_a, 16, 64, 256)
    # Case B: ragged shapes — exercises row padding, vocab padding/masking, multiple row tiles.
    case_b = make_case(k_b, 25, 64, 200)

    checks = [
        (case_a, dict(beta=0.5, temperature=1.0, weight_hard_loss=0.5,
                      weight_soft_loss=0.5, use_bf16=False, block_v=128), 1e-4),
        (case_a, dict(beta=0.5, temperature=1.0, weight_hard_loss=0.5,
                      weight_soft_loss=0.5, use_bf16=True, block_v=128), 2e-2),
        (case_a, dict(beta=0.7, temperature=2.0, weight_hard_loss=0.3,
                      weight_soft_loss=0.7, use_bf16=False, block_v=128), 1e-4),
        (case_b, dict(beta=0.5, temperature=1.0, weight_hard_loss=0.5,
                      weight_soft_loss=0.5, use_bf16=False,
                      block_rows=8, block_v=128), 1e-4),
    ]

    for (xs, xt, tgt, ws, wt, bs, bt), kw, tol in checks:
        loss = lm_head_jsd_loss(xs, xt, tgt, ws, wt, bs, bt, **kw)
        loss = jax.block_until_ready(loss)
        ref = _reference(xs, xt, tgt, ws, wt, bs, bt,
                         beta=kw["beta"], temperature=kw["temperature"],
                         wh=kw["weight_hard_loss"], wsoft=kw["weight_soft_loss"],
                         ignore=IGNORE_INDEX)
        assert jnp.allclose(loss, ref, rtol=tol, atol=tol), (kw, float(loss), float(ref))

    print("KERNEL_OK")
</pallas_src>

<mosaic_0001>
module attributes {stable_mosaic.version = 11 : i64} {
  func.func @_jsd_lm_head_kernel(%arg0: i32, %arg1: i32, %arg2: i32, %arg3: memref<8x1xi32, #tpu.memory_space<vmem>>, %arg4: memref<8x32xf32, #tpu.memory_space<vmem>>, %arg5: memref<8x64xf32, #tpu.memory_space<vmem>>, %arg6: memref<128x32xf32, #tpu.memory_space<vmem>>, %arg7: memref<128x64xf32, #tpu.memory_space<vmem>>, %arg8: memref<1x128xf32, #tpu.memory_space<vmem>>, %arg9: memref<1x128xf32, #tpu.memory_space<vmem>>, %arg10: memref<1x8x128xf32, #tpu.memory_space<vmem>>, %arg11: memref<8x1xf32, #tpu.memory_space<vmem>>, %arg12: memref<8x1xf32, #tpu.memory_space<vmem>>, %arg13: memref<8x1xf32, #tpu.memory_space<vmem>>, %arg14: memref<8x1xf32, #tpu.memory_space<vmem>>, %arg15: memref<8x1xf32, #tpu.memory_space<vmem>>, %arg16: memref<8x1xf32, #tpu.memory_space<vmem>>, %arg17: memref<8x1xf32, #tpu.memory_space<vmem>>, %arg18: memref<8x1xf32, #tpu.memory_space<vmem>>) attributes {dimension_semantics = [#tpu.dimension_semantics<parallel>, #tpu.dimension_semantics<arbitrary>, #tpu.dimension_semantics<arbitrary>], iteration_bounds = array<i64: 2, 2, 2>, scalar_prefetch = 0 : i64, scratch_operands = 8 : i64, tpu.core_type = #tpu.core_type<tc>, window_params = [{transform_indices = @transform_0, window_bounds = array<i64: 8, 1>}, {transform_indices = @transform_1, window_bounds = array<i64: 8, 32>}, {transform_indices = @transform_2, window_bounds = array<i64: 8, 64>}, {transform_indices = @transform_3, window_bounds = array<i64: 128, 32>}, {transform_indices = @transform_4, window_bounds = array<i64: 128, 64>}, {transform_indices = @transform_5, window_bounds = array<i64: 1, 128>}, {transform_indices = @transform_6, window_bounds = array<i64: 1, 128>}, {transform_indices = @transform_7, window_bounds = array<i64: 1, 8, 128>}]} {
    %c0 = arith.constant 0 : index
    %c0_0 = arith.constant 0 : index
    %0 = vector.load %arg4[%c0, %c0_0] : memref<8x32xf32, #tpu.memory_space<vmem>>, vector<8x32xf32>
    %c0_1 = arith.constant 0 : index
    %c0_2 = arith.constant 0 : index
    %1 = vector.load %arg6[%c0_1, %c0_2] : memref<128x32xf32, #tpu.memory_space<vmem>>, vector<128x32xf32>
    %cst = arith.constant dense<0.000000e+00> : vector<8x128xf32>
    %2 = tpu.matmul %0, %1, %cst {dimension_numbers = #tpu.dot_dimension_numbers<[1], [1], [0], [0], [0, 0, 1, 0], [], []>} : vector<8x32xf32>, vector<128x32xf32>, vector<8x128xf32> -> vector<8x128xf32>
    %c0_3 = arith.constant 0 : index
    %c0_4 = arith.constant 0 : index
    %3 = vector.load %arg8[%c0_3, %c0_4] : memref<1x128xf32, #tpu.memory_space<vmem>>, vector<1x128xf32>
    %4 = vector.broadcast %3 : vector<1x128xf32> to vector<8x128xf32>
    %5 = arith.addf %2, %4 : vector<8x128xf32>
    %c0_5 = arith.constant 0 : index
    %c0_6 = arith.constant 0 : index
    %6 = vector.load %arg5[%c0_5, %c0_6] : memref<8x64xf32, #tpu.memory_space<vmem>>, vector<8x64xf32>
    %c0_7 = arith.constant 0 : index
    %c0_8 = arith.constant 0 : index
    %7 = vector.load %arg7[%c0_7, %c0_8] : memref<128x64xf32, #tpu.memory_space<vmem>>, vector<128x64xf32>
    %cst_9 = arith.constant dense<0.000000e+00> : vector<8x128xf32>
    %8 = tpu.matmul %6, %7, %cst_9 {dimension_numbers = #tpu.dot_dimension_numbers<[1], [1], [0], [0], [0, 0, 1, 0], [], []>} : vector<8x64xf32>, vector<128x64xf32>, vector<8x128xf32> -> vector<8x128xf32>
    %c0_10 = arith.constant 0 : index
    %c0_11 = arith.constant 0 : index
    %9 = vector.load %arg9[%c0_10, %c0_11] : memref<1x128xf32, #tpu.memory_space<vmem>>, vector<1x128xf32>
    %10 = vector.broadcast %9 : vector<1x128xf32> to vector<8x128xf32>
    %11 = arith.addf %8, %10 : vector<8x128xf32>
    %c0_i32 = arith.constant 0 : i32
    %12 = arith.cmpi eq, %arg1, %c0_i32 : i32
    %c0_i32_12 = arith.constant 0 : i32
    %13 = arith.cmpi eq, %arg2, %c0_i32_12 : i32
    %14 = arith.andi %12, %13 : i1
    %15 = arith.extui %14 : i1 to i32
    %c0_i32_13 = arith.constant 0 : i32
    %16 = arith.cmpi ne, %15, %c0_i32_13 : i32
    scf.if %16 {
      %cst_23 = arith.constant 0xFF800000 : f32
      %33 = vector.broadcast %cst_23 : f32 to vector<8x1xf32>
      %cst_24 = arith.constant 0.000000e+00 : f32
      %34 = vector.broadcast %cst_24 : f32 to vector<8x1xf32>
      %c0_25 = arith.constant 0 : index
      %c0_26 = arith.constant 0 : index
      %35 = vector.load %arg11[%c0_25, %c0_26] : memref<8x1xf32, #tpu.memory_space<vmem>>, vector<8x1xf32>
      tpu.vector_store %arg11[%c0_25, %c0_26], %33 {strides = array<i32>} : memref<8x1xf32, #tpu.memory_space<vmem>>, vector<8x1xf32>,
      %c0_27 = arith.constant 0 : index
      %c0_28 = arith.constant 0 : index
      %36 = vector.load %arg12[%c0_27, %c0_28] : memref<8x1xf32, #tpu.memory_space<vmem>>, vector<8x1xf32>
      tpu.vector_store %arg12[%c0_27, %c0_28], %34 {strides = array<i32>} : memref<8x1xf32, #tpu.memory_space<vmem>>, vector<8x1xf32>,
      %c0_29 = arith.constant 0 : index
      %c0_30 = arith.constant 0 : index
      %37 = vector.load %arg13[%c0_29, %c0_30] : memref<8x1xf32, #tpu.memory_space<vmem>>, vector<8x1xf32>
      tpu.vector_store %arg13[%c0_29, %c0_30], %33 {strides = array<i32>} : memref<8x1xf32, #tpu.memory_space<vmem>>, vector<8x1xf32>,
      %c0_31 = arith.constant 0 : index
      %c0_32 = arith.constant 0 : index
      %38 = vector.load %arg14[%c0_31, %c0_32] : memref<8x1xf32, #tpu.memory_space<vmem>>, vector<8x1xf32>
      tpu.vector_store %arg14[%c0_31, %c0_32], %34 {strides = array<i32>} : memref<8x1xf32, #tpu.memory_space<vmem>>, vector<8x1xf32>,
      %c0_33 = arith.constant 0 : index
      %c0_34 = arith.constant 0 : index
      %39 = vector.load %arg15[%c0_33, %c0_34] : memref<8x1xf32, #tpu.memory_space<vmem>>, vector<8x1xf32>
      tpu.vector_store %arg15[%c0_33, %c0_34], %33 {strides = array<i32>} : memref<8x1xf32, #tpu.memory_space<vmem>>, vector<8x1xf32>,
      %c0_35 = arith.constant 0 : index
      %c0_36 = arith.constant 0 : index
      %40 = vector.load %arg16[%c0_35, %c0_36] : memref<8x1xf32, #tpu.memory_space<vmem>>, vector<8x1xf32>
      tpu.vector_store %arg16[%c0_35, %c0_36], %34 {strides = array<i32>} : memref<8x1xf32, #tpu.memory_space<vmem>>, vector<8x1xf32>,
      %c0_37 = arith.constant 0 : index
      %c0_38 = arith.constant 0 : index
      %41 = vector.load %arg17[%c0_37, %c0_38] : memref<8x1xf32, #tpu.memory_space<vmem>>, vector<8x1xf32>
      tpu.vector_store %arg17[%c0_37, %c0_38], %34 {strides = array<i32>} : memref<8x1xf32, #tpu.memory_space<vmem>>, vector<8x1xf32>,
      %c0_39 = arith.constant 0 : index
      %c0_40 = arith.constant 0 : index
      %42 = vector.load %arg18[%c0_39, %c0_40] : memref<8x1xf32, #tpu.memory_space<vmem>>, vector<8x1xf32>
      tpu.vector_store %arg18[%c0_39, %c0_40], %34 {strides = array<i32>} : memref<8x1xf32, #tpu.memory_space<vmem>>, vector<8x1xf32>,
    } else {
    }
    %c0_i32_14 = arith.constant 0 : i32
    %17 = arith.cmpi eq, %arg1, %c0_i32_14 : i32
    %18 = arith.extui %17 : i1 to i32
    %c0_i32_15 = arith.constant 0 : i32
    %19 = arith.cmpi ne, %18, %c0_i32_15 : i32
    scf.if %19 {
      %c0_23 = arith.constant 0 : index
      %c0_24 = arith.constant 0 : index
      %33 = vector.load %arg11[%c0_23, %c0_24] : memref<8x1xf32, #tpu.memory_space<vmem>>, vector<8x1xf32>
      %cst_25 = arith.constant dense<0xFF800000> : vector<8xf32>
      %34 = vector.multi_reduction <maximumf>, %5, %cst_25 [1] : vector<8x128xf32> to vector<8xf32>
      %35 = vector.shape_cast %34 : vector<8xf32> to vector<8x1xf32>
      %36 = arith.maximumf %33, %35 : vector<8x1xf32>
      %c0_26 = arith.constant 0 : index
      %c0_27 = arith.constant 0 : index
      %37 = vector.load %arg12[%c0_26, %c0_27] : memref<8x1xf32, #tpu.memory_space<vmem>>, vector<8x1xf32>
      %38 = arith.subf %33, %36 : vector<8x1xf32>
      %39 = math.exp %38 : vector<8x1xf32>
      %40 = arith.mulf %37, %39 : vector<8x1xf32>
      %41 = vector.broadcast %36 : vector<8x1xf32> to vector<8x128xf32>
      %42 = arith.subf %5, %41 : vector<8x128xf32>
      %43 = math.exp %42 : vector<8x128xf32>
      %cst_28 = arith.constant dense<0.000000e+00> : vector<8xf32>
      %44 = vector.multi_reduction <add>, %43, %cst_28 [1] : vector<8x128xf32> to vector<8xf32>
      %45 = vector.shape_cast %44 : vector<8xf32> to vector<8x1xf32>
      %46 = arith.addf %40, %45 : vector<8x1xf32>
      %c0_29 = arith.constant 0 : index
      %c0_30 = arith.constant 0 : index
      %47 = vector.load %arg12[%c0_29, %c0_30] : memref<8x1xf32, #tpu.memory_space<vmem>>, vector<8x1xf32>
      tpu.vector_store %arg12[%c0_29, %c0_30], %46 {strides = array<i32>} : memref<8x1xf32, #tpu.memory_space<vmem>>, vector<8x1xf32>,
      %c0_31 = arith.constant 0 : index
      %c0_32 = arith.constant 0 : index
      %48 = vector.load %arg11[%c0_31, %c0_32] : memref<8x1xf32, #tpu.memory_space<vmem>>, vector<8x1xf32>
      tpu.vector_store %arg11[%c0_31, %c0_32], %36 {strides = array<i32>} : memref<8x1xf32, #tpu.memory_space<vmem>>, vector<8x1xf32>,
      %c0_33 = arith.constant 0 : index
      %c0_34 = arith.constant 0 : index
      %49 = vector.load %arg13[%c0_33, %c0_34] : memref<8x1xf32, #tpu.memory_space<vmem>>, vector<8x1xf32>
      %cst_35 = arith.constant dense<0xFF800000> : vector<8xf32>
      %50 = vector.multi_reduction <maximumf>, %11, %cst_35 [1] : vector<8x128xf32> to vector<8xf32>
      %51 = vector.shape_cast %50 : vector<8xf32> to vector<8x1xf32>
      %52 = arith.maximumf %49, %51 : vector<8x1xf32>
      %c0_36 = arith.constant 0 : index
      %c0_37 = arith.constant 0 : index
      %53 = vector.load %arg14[%c0_36, %c0_37] : memref<8x1xf32, #tpu.memory_space<vmem>>, vector<8x1xf32>
      %54 = arith.subf %49, %52 : vector<8x1xf32>
      %55 = math.exp %54 : vector<8x1xf32>
      %56 = arith.mulf %53, %55 : vector<8x1xf32>
      %57 = vector.broadcast %52 : vector<8x1xf32> to vector<8x128xf32>
      %58 = arith.subf %11, %57 : vector<8x128xf32>
      %59 = math.exp %58 : vector<8x128xf32>
      %cst_38 = arith.constant dense<0.000000e+00> : vector<8xf32>
      %60 = vector.multi_reduction <add>, %59, %cst_38 [1] : vector<8x128xf32> to vector<8xf32>
      %61 = vector.shape_cast %60 : vector<8xf32> to vector<8x1xf32>
      %62 = arith.addf %56, %61 : vector<8x1xf32>
      %c0_39 = arith.constant 0 : index
      %c0_40 = arith.constant 0 : index
      %63 = vector.load %arg14[%c0_39, %c0_40] : memref<8x1xf32, #tpu.memory_space<vmem>>, vector<8x1xf32>
      tpu.vector_store %arg14[%c0_39, %c0_40], %62 {strides = array<i32>} : memref<8x1xf32, #tpu.memory_space<vmem>>, vector<8x1xf32>,
      %c0_41 = arith.constant 0 : index
      %c0_42 = arith.constant 0 : index
      %64 = vector.load %arg13[%c0_41, %c0_42] : memref<8x1xf32, #tpu.memory_space<vmem>>, vector<8x1xf32>
      tpu.vector_store %arg13[%c0_41, %c0_42], %52 {strides = array<i32>} : memref<8x1xf32, #tpu.memory_space<vmem>>, vector<8x1xf32>,
      %c128_i32 = arith.constant 128 : i32
      %65 = arith.muli %arg2, %c128_i32 : i32
      %66 = tpu.iota {dimensions = array<i32: 1>} : vector<8x128xi32>
      %67 = vector.broadcast %65 : i32 to vector<8x128xi32>
      %68 = arith.addi %67, %66 : vector<8x128xi32>
      %c0_43 = arith.constant 0 : index
      %c0_44 = arith.constant 0 : index
      %69 = vector.load %arg3[%c0_43, %c0_44] : memref<8x1xi32, #tpu.memory_space<vmem>>, vector<8x1xi32>
      %c0_45 = arith.constant 0 : index
      %c0_46 = arith.constant 0 : index
      %70 = vector.load %arg17[%c0_45, %c0_46] : memref<8x1xf32, #tpu.memory_space<vmem>>, vector<8x1xf32>
      %71 = vector.broadcast %69 : vector<8x1xi32> to vector<8x128xi32>
      %72 = arith.cmpi eq, %68, %71 : vector<8x128xi32>
      %cst_47 = arith.constant 0.000000e+00 : f32
      %73 = vector.broadcast %cst_47 : f32 to vector<8x128xf32>
      %74 = arith.select %72, %5, %73 : vector<8x128xi1>, vector<8x128xf32>
      %cst_48 = arith.constant dense<0.000000e+00> : vector<8xf32>
      %75 = vector.multi_reduction <add>, %74, %cst_48 [1] : vector<8x128xf32> to vector<8xf32>
      %76 = vector.shape_cast %75 : vector<8xf32> to vector<8x1xf32>
      %77 = arith.addf %70, %76 : vector<8x1xf32>
      %c0_49 = arith.constant 0 : index
      %c0_50 = arith.constant 0 : index
      %78 = vector.load %arg17[%c0_49, %c0_50] : memref<8x1xf32, #tpu.memory_space<vmem>>, vector<8x1xf32>
      tpu.vector_store %arg17[%c0_49, %c0_50], %77 {strides = array<i32>} : memref<8x1xf32, #tpu.memory_space<vmem>>, vector<8x1xf32>,
    } else {
    }
    %c1_i32 = arith.constant 1 : i32
    %20 = arith.cmpi eq, %arg1, %c1_i32 : i32
    %c0_i32_16 = arith.constant 0 : i32
    %21 = arith.cmpi eq, %arg2, %c0_i32_16 : i32
    %22 = arith.andi %20, %21 : i1
    %23 = arith.extui %22 : i1 to i32
    %c0_i32_17 = arith.constant 0 : i32
    %24 = arith.cmpi ne, %23, %c0_i32_17 : i32
    scf.if %24 {
      %c0_23 = arith.constant 0 : index
      %c0_24 = arith.constant 0 : index
      %33 = vector.load %arg11[%c0_23, %c0_24] : memref<8x1xf32, #tpu.memory_space<vmem>>, vector<8x1xf32>
      %c0_25 = arith.constant 0 : index
      %c0_26 = arith.constant 0 : index
      %34 = vector.load %arg12[%c0_25, %c0_26] : memref<8x1xf32, #tpu.memory_space<vmem>>, vector<8x1xf32>
      %35 = math.log %34 : vector<8x1xf32>
      %36 = arith.addf %33, %35 : vector<8x1xf32>
      %c0_27 = arith.constant 0 : index
      %c0_28 = arith.constant 0 : index
      %37 = vector.load %arg11[%c0_27, %c0_28] : memref<8x1xf32, #tpu.memory_space<vmem>>, vector<8x1xf32>
      tpu.vector_store %arg11[%c0_27, %c0_28], %36 {strides = array<i32>} : memref<8x1xf32, #tpu.memory_space<vmem>>, vector<8x1xf32>,
      %c0_29 = arith.constant 0 : index
      %c0_30 = arith.constant 0 : index
      %38 = vector.load %arg13[%c0_29, %c0_30] : memref<8x1xf32, #tpu.memory_space<vmem>>, vector<8x1xf32>
      %c0_31 = arith.constant 0 : index
      %c0_32 = arith.constant 0 : index
      %39 = vector.load %arg14[%c0_31, %c0_32] : memref<8x1xf32, #tpu.memory_space<vmem>>, vector<8x1xf32>
      %40 = math.log %39 : vector<8x1xf32>
      %41 = arith.addf %38, %40 : vector<8x1xf32>
      %c0_33 = arith.constant 0 : index
      %c0_34 = arith.constant 0 : index
      %42 = vector.load %arg13[%c0_33, %c0_34] : memref<8x1xf32, #tpu.memory_space<vmem>>, vector<8x1xf32>
      tpu.vector_store %arg13[%c0_33, %c0_34], %41 {strides = array<i32>} : memref<8x1xf32, #tpu.memory_space<vmem>>, vector<8x1xf32>,
    } else {
    }
    %c1_i32_18 = arith.constant 1 : i32
    %25 = arith.cmpi eq, %arg1, %c1_i32_18 : i32
    %26 = arith.extui %25 : i1 to i32
    %c0_i32_19 = arith.constant 0 : i32
    %27 = arith.cmpi ne, %26, %c0_i32_19 : i32
    scf.if %27 {
      %c0_23 = arith.constant 0 : index
      %c0_24 = arith.constant 0 : index
      %33 = vector.load %arg11[%c0_23, %c0_24] : memref<8x1xf32, #tpu.memory_space<vmem>>, vector<8x1xf32>
      %34 = vector.broadcast %33 : vector<8x1xf32> to vector<8x128xf32>
      %35 = arith.subf %5, %34 : vector<8x128xf32>
      %c0_25 = arith.constant 0 : index
      %c0_26 = arith.constant 0 : index
      %36 = vector.load %arg13[%c0_25, %c0_26] : memref<8x1xf32, #tpu.memory_space<vmem>>, vector<8x1xf32>
      %37 = vector.broadcast %36 : vector<8x1xf32> to vector<8x128xf32>
      %38 = arith.subf %11, %37 : vector<8x128xf32>
      %39 = math.exp %35 : vector<8x128xf32>
      %40 = math.exp %38 : vector<8x128xf32>
      %cst_27 = arith.constant 5.000000e-01 : f32
      %41 = vector.broadcast %cst_27 : f32 to vector<8x128xf32>
      %42 = arith.mulf %41, %39 : vector<8x128xf32>
      %cst_28 = arith.constant 5.000000e-01 : f32
      %43 = vector.broadcast %cst_28 : f32 to vector<8x128xf32>
      %44 = arith.mulf %43, %40 : vector<8x128xf32>
      %45 = arith.addf %42, %44 : vector<8x128xf32>
      %46 = math.log %45 : vector<8x128xf32>
      %cst_29 = arith.constant 0.000000e+00 : f32
      %47 = vector.broadcast %cst_29 : f32 to vector<8x128xf32>
      %48 = arith.cmpf ogt, %39, %47 : vector<8x128xf32>
      %cst_30 = arith.constant 5.000000e-01 : f32
      %49 = vector.broadcast %cst_30 : f32 to vector<8x128xf32>
      %50 = arith.mulf %49, %39 : vector<8x128xf32>
      %51 = arith.subf %35, %46 : vector<8x128xf32>
      %52 = arith.mulf %50, %51 : vector<8x128xf32>
      %cst_31 = arith.constant 0.000000e+00 : f32
      %53 = vector.broadcast %cst_31 : f32 to vector<8x128xf32>
      %54 = arith.select %48, %52, %53 : vector<8x128xi1>, vector<8x128xf32>
      %cst_32 = arith.constant 0.000000e+00 : f32
      %55 = vector.broadcast %cst_32 : f32 to vector<8x128xf32>
      %56 = arith.cmpf ogt, %40, %55 : vector<8x128xf32>
      %cst_33 = arith.constant 5.000000e-01 : f32
      %57 = vector.broadcast %cst_33 : f32 to vector<8x128xf32>
      %58 = arith.mulf %57, %40 : vector<8x128xf32>
      %59 = arith.subf %38, %46 : vector<8x128xf32>
      %60 = arith.mulf %58, %59 : vector<8x128xf32>
      %cst_34 = arith.constant 0.000000e+00 : f32
      %61 = vector.broadcast %cst_34 : f32 to vector<8x128xf32>
      %62 = arith.select %56, %60, %61 : vector<8x128xi1>, vector<8x128xf32>
      %63 = arith.addf %54, %62 : vector<8x128xf32>
      %c0_35 = arith.constant 0 : index
      %c0_36 = arith.constant 0 : index
      %64 = vector.load %arg18[%c0_35, %c0_36] : memref<8x1xf32, #tpu.memory_space<vmem>>, vector<8x1xf32>
      %cst_37 = arith.constant dense<0.000000e+00> : vector<8xf32>
      %65 = vector.multi_reduction <add>, %63, %cst_37 [1] : vector<8x128xf32> to vector<8xf32>
      %66 = vector.shape_cast %65 : vector<8xf32> to vector<8x1xf32>
      %67 = arith.addf %64, %66 : vector<8x1xf32>
      %c0_38 = arith.constant 0 : index
      %c0_39 = arith.constant 0 : index
      %68 = vector.load %arg18[%c0_38, %c0_39] : memref<8x1xf32, #tpu.memory_space<vmem>>, vector<8x1xf32>
      tpu.vector_store %arg18[%c0_38, %c0_39], %67 {strides = array<i32>} : memref<8x1xf32, #tpu.memory_space<vmem>>, vector<8x1xf32>,
    } else {
    }
    %c1_i32_20 = arith.constant 1 : i32
    %28 = arith.cmpi eq, %arg1, %c1_i32_20 : i32
    %c1_i32_21 = arith.constant 1 : i32
    %29 = arith.cmpi eq, %arg2, %c1_i32_21 : i32
    %30 = arith.andi %28, %29 : i1
    %31 = arith.extui %30 : i1 to i32
    %c0_i32_22 = arith.constant 0 : i32
    %32 = arith.cmpi ne, %31, %c0_i32_22 : i32
    scf.if %32 {
      %c0_23 = arith.constant 0 : index
      %c0_24 = arith.constant 0 : index
      %33 = vector.load %arg3[%c0_23, %c0_24] : memref<8x1xi32, #tpu.memory_space<vmem>>, vector<8x1xi32>
      %c-100_i32 = arith.constant -100 : i32
      %34 = vector.broadcast %c-100_i32 : i32 to vector<8x1xi32>
      %35 = arith.cmpi ne, %33, %34 : vector<8x1xi32>
      %c0_25 = arith.constant 0 : index
      %c0_26 = arith.constant 0 : index
      %36 = vector.load %arg11[%c0_25, %c0_26] : memref<8x1xf32, #tpu.memory_space<vmem>>, vector<8x1xf32>
      %c0_27 = arith.constant 0 : index
      %c0_28 = arith.constant 0 : index
      %37 = vector.load %arg17[%c0_27, %c0_28] : memref<8x1xf32, #tpu.memory_space<vmem>>, vector<8x1xf32>
      %38 = arith.subf %36, %37 : vector<8x1xf32>
      %cst_29 = arith.constant 0.000000e+00 : f32
      %39 = vector.broadcast %cst_29 : f32 to vector<8x1xf32>
      %40 = arith.select %35, %38, %39 : vector<8x1xi1>, vector<8x1xf32>
      %c0_30 = arith.constant 0 : index
      %c0_31 = arith.constant 0 : index
      %41 = vector.load %arg18[%c0_30, %c0_31] : memref<8x1xf32, #tpu.memory_space<vmem>>, vector<8x1xf32>
      %42 = vector.shape_cast %40 : vector<8x1xf32> to vector<1x8x1xf32>
      %cst_32 = arith.constant dense<0.000000e+00> : vector<1xf32>
      %43 = vector.multi_reduction <add>, %42, %cst_32 [1, 2] : vector<1x8x1xf32> to vector<1xf32>
      %44 = vector.shape_cast %43 : vector<1xf32> to vector<1x1x1xf32>
      %45 = vector.extract %44[0, 0, 0] : f32 from vector<1x1x1xf32>
      %46 = vector.shape_cast %41 : vector<8x1xf32> to vector<1x8x1xf32>
      %cst_33 = arith.constant dense<0.000000e+00> : vector<1xf32>
      %47 = vector.multi_reduction <add>, %46, %cst_33 [1, 2] : vector<1x8x1xf32> to vector<1xf32>
      %48 = vector.shape_cast %47 : vector<1xf32> to vector<1x1x1xf32>
      %49 = vector.extract %48[0, 0, 0] : f32 from vector<1x1x1xf32>
      %50 = tpu.iota {dimensions = array<i32: 2>} : vector<1x8x128xi32>
      %c0_i32_34 = arith.constant 0 : i32
      %51 = vector.broadcast %c0_i32_34 : i32 to vector<1x8x128xi32>
      %52 = arith.cmpi eq, %50, %51 : vector<1x8x128xi32>
      %c1_i32_35 = arith.constant 1 : i32
      %53 = vector.broadcast %c1_i32_35 : i32 to vector<1x8x128xi32>
      %54 = arith.cmpi eq, %50, %53 : vector<1x8x128xi32>
      %cst_36 = arith.constant 0.000000e+00 : f32
      %55 = vector.broadcast %49 : f32 to vector<1x8x128xf32>
      %56 = vector.broadcast %cst_36 : f32 to vector<1x8x128xf32>
      %57 = arith.select %54, %55, %56 : vector<1x8x128xi1>, vector<1x8x128xf32>
      %58 = vector.broadcast %45 : f32 to vector<1x8x128xf32>
      %59 = arith.select %52, %58, %57 : vector<1x8x128xi1>, vector<1x8x128xf32>
      %c0_37 = arith.constant 0 : index
      %c0_38 = arith.constant 0 : index
      %c0_39 = arith.constant 0 : index
      %60 = vector.load %arg10[%c0_37, %c0_38, %c0_39] : memref<1x8x128xf32, #tpu.memory_space<vmem>>, vector<1x8x128xf32>
      tpu.vector_store %arg10[%c0_37, %c0_38, %c0_39], %59 {strides = array<i32>} : memref<1x8x128xf32, #tpu.memory_space<vmem>>, vector<1x8x128xf32>,
    } else {
    }
    return
  }
  func.func @transform_0(%arg0: i32, %arg1: i32, %arg2: i32) -> (i32, i32) {
    %c0_i32 = arith.constant 0 : i32
    %c0_i32_0 = arith.constant 0 : i32
    return %arg0, %c0_i32 : i32, i32
  }
  func.func @transform_1(%arg0: i32, %arg1: i32, %arg2: i32) -> (i32, i32) {
    %c0_i32 = arith.constant 0 : i32
    %c0_i32_0 = arith.constant 0 : i32
    return %arg0, %c0_i32 : i32, i32
  }
  func.func @transform_2(%arg0: i32, %arg1: i32, %arg2: i32) -> (i32, i32) {
    %c0_i32 = arith.constant 0 : i32
    %c0_i32_0 = arith.constant 0 : i32
    return %arg0, %c0_i32 : i32, i32
  }
  func.func @transform_3(%arg0: i32, %arg1: i32, %arg2: i32) -> (i32, i32) {
    %c0_i32 = arith.constant 0 : i32
    %c0_i32_0 = arith.constant 0 : i32
    return %arg2, %c0_i32 : i32, i32
  }
  func.func @transform_4(%arg0: i32, %arg1: i32, %arg2: i32) -> (i32, i32) {
    %c0_i32 = arith.constant 0 : i32
    %c0_i32_0 = arith.constant 0 : i32
    return %arg2, %c0_i32 : i32, i32
  }
  func.func @transform_5(%arg0: i32, %arg1: i32, %arg2: i32) -> (i32, i32) {
    %c0_i32 = arith.constant 0 : i32
    %c0_i32_0 = arith.constant 0 : i32
    return %c0_i32, %arg2 : i32, i32
  }
  func.func @transform_6(%arg0: i32, %arg1: i32, %arg2: i32) -> (i32, i32) {
    %c0_i32 = arith.constant 0 : i32
    %c0_i32_0 = arith.constant 0 : i32
    return %c0_i32, %arg2 : i32, i32
  }
  func.func @transform_7(%arg0: i32, %arg1: i32, %arg2: i32) -> (i32, i32, i32) {
    %c0_i32 = arith.constant 0 : i32
    %c0_i32_0 = arith.constant 0 : i32
    %c0_i32_1 = arith.constant 0 : i32
    return %arg0, %c0_i32, %c0_i32_0 : i32, i32, i32
  }
}

</mosaic_0001>

<bundles_post_ra>
// kernel: tpu_custom_call.1
= control target key start
LH: loop header
LB: loop body
LE: loop exit
PB: predicated region body
PF: predicated region fallthrough
CT: control target
= control target key end

     0   :  { %s1783_s0 = inlined_call_operand.vmem [shape: s32[16,1], index: 0, kind: input, shape index: {}]   ;;  %s1784_s1 = inlined_call_operand.vmem [shape: f32[16,32], index: 1, kind: input, shape index: {}]   ;;  %s1785_s2 = inlined_call_operand.vmem [shape: f32[16,64], index: 2, kind: input, shape index: {}]   ;;  %s1786_s3 = inlined_call_operand.vmem [shape: f32[256,32], index: 3, kind: input, shape index: {}]   ;;  %s1787_s4 = inlined_call_operand.vmem [shape: f32[256,64], index: 4, kind: input, shape index: {}]   ;;  %s1788_s5 = inlined_call_operand.vmem [shape: f32[1,256], index: 5, kind: input, shape index: {}]   ;;  %s1789_s6 = inlined_call_operand.vmem [shape: f32[1,256], index: 6, kind: input, shape index: {}]   ;;  %s1790_s7 = inlined_call_operand.hbm [shape: f32[2,8,128], index: 7, kind: output, shape index: {}]  }
   0x1   :  { %1793 = sst [smem:[#allocation16_spill]] %s1783_s0 }
   0x2   :  { %12 = vsyncpa [#allocation11], 0 }
   0x3   :  { %14 = vsyncpa [#allocation11 + $0x1], 0  ;;  %s1462_s24 = smov 0   ;;  %s1464_s25 = smov 0  }
   0x4   :  { %s1466_s26 = smov 0   ;;  %s1468_s27 = smov 0  }
   0x5   :  { %s1470_s28 = smov 0   ;;  %s1472_s29 = smov 0  }
   0x6   :  { %s1474_s30 = smov 0   ;;  %s1476_s8 = smov 0  }
   0x7   :  { %s1478_s9 = smov 0   ;;  %s1480_s10 = smov 0  }
   0x8 LB: > { %s1027_s11 = sadd.s32 4294967295, %s1413_s10   ;;  %s1028_s12 = sadd.s32 4294967294, %s1413_s10   ;;  %s1413_s10 = sphi %s1480_s10, %s20_s10   ;;  %s1409_s9 = sphi %s1478_s9, %s1813_s9   ;;  %s1405_s8 = sphi %s1476_s8, %s1812_s8   ;;  %s1401_s30 = sphi %s1474_s30, %s1811_s30   ;;  %s1397_s29 = sphi %s1472_s29, %s1810_s29   ;;  %s1393_s28 = sphi %s1470_s28, %s1809_s28   ;;  %s1389_s27 = sphi %s1468_s27, %s1808_s27   ;;  %s1385_s26 = sphi %s1466_s26, %s1807_s26   ;;  %s1381_s25 = sphi %s1464_s25, %s1806_s25   ;;  %s1377_s24 = sphi %s1462_s24, %s1805_s24  }
   0x9   : > { %s32_s13 = sadd.s32 1, %s1401_s30  ;;  %s35_s14 = sadd.s32 1, %s1405_s8 }
   0xa   : > { %p33_p0 = scmp.ge.s32.totalorder %s32_s13, 2  ;;  %s39_s15 = sadd.s32 1, %s1409_s9 }
   0xb   : > { %p238_p1 = scmp.ne.s32.totalorder %s1385_s26, %s1381_s25  ;;  %p239_p2 = scmp.eq.s32.totalorder %s1027_s11, 7 }
   0xc   : > { %s1815_s13 = smov (%p33_p0, %s32_s13), 0  ;;  %s1817_s14 = smov (!%p33_p0, %s35_s14), %s1405_s8 }
   0xd   : > { %1794 = sst [smem:[#allocation13_spill]] %s1815_s13  ;;  %p244_p3 = scmp.ne.s32.totalorder %s1381_s25, %s1377_s24 }
   0xe   : > { %p37_p4 = scmp.ge.s32.totalorder %s1817_s14, 2  ;;  %p245_p5 = scmp.eq.s32.totalorder %s1028_s12, 7 }
   0xf   : > { %p1524_p6 = por %p239_p2, %p238_p1  ;;  %p1031_p7 = scmp.ge.s32.totalorder %s1413_s10, 1 }
  0x10   : > { %s1819_s14 = smov (%p37_p4, %s1817_s14), 0  ;;  %s1821_s15 = smov (!%p37_p4, %s39_s15), %s1409_s9 }
  0x11   : > { %1796 = sst [smem:[#allocation14_spill]] %s1819_s14  ;;  %p1532_p8 = por %p245_p5, %p244_p3 }
  0x12   : > { %p314_p9 = scmp.lt.s32.totalorder %s1413_s10, 9  ;;  %p41_p10 = scmp.ge.s32.totalorder %s1821_s15, 2 }
  0x13   : > { %s228_s19 = sadd.s32 1, %s1385_s26 }
  0x14   : > { %p315_p11 = pnand %p1031_p7, %p314_p9  ;;  %s1823_s15 = smov (%p41_p10, %s1821_s15), 0 }
  0x15   : > { %1798 = sst [smem:[#allocation15_spill]] %s1823_s15  ;;  %s225_s18 = ssub.s32 %s1409_s9, %s1823_s15 }
  0x16   : > { %p226_p12 = scmp.eq.s32.totalorder %s225_s18, 0  ;;  %318 = sbr.rel (%p315_p11) target bundleno = 1334 (0x536), region = 48 }
  0x17   : > { %s1791_s21 = sand.u32 (!%p315_p11), 1, %s1381_s25   ;;  %s1036_s22 = sshll.u32 (!%p315_p11), %s1389_s27, 4 }
  0x18   : > { %s1543_s20 = scalar_select %p226_p12, %s1385_s26, %s228_s19  }
  0x19   : > { %s1549_s23 = sshll.u32 (!%p315_p11), %s1791_s21, 3  ;;  %p382_p13 = scmp.lt.s32.totalorder (!%p315_p11), %s1036_s22, 31 }
  0x1a   : > { %p369_p0 = scmp.lt.s32.totalorder (!%p315_p11), %s1397_s29, 1  ;;  %s1799_s0 = sld [smem:[#allocation16_spill]] (!%p315_p11) }
  0x1b   : > { %v1415_v0 = vmov 0.0   ;;  %vm1416_vm0 = vmmov 0   ;;  %s1825_s22 = smov (!%p382_p13, %s1036_s22), 31  ;;  %vm423_vm1 = vcmask 261120   ;;  %vm569_vm2 = vcmask 523264   ;;  %p691_p1 = scmp.eq.s32.totalorder %s1393_s28, 0 }
  0x1c   : > { %1117 = vmatprep.subr.mxu0 %v1415_v0  ;;  %1152 = vmatprep.subr.mxu1 %v1415_v0  ;;  %s370_s11 = scalar_select %p369_p0, %s1397_s29, 1 }
  0x1d   : > { %1149 = vmatprep.mubr.msk.f32.mxu0 %vm1416_vm0, %v1415_v0  ;;  %1184 = vmatprep.mubr.msk.f32.mxu1 %vm1416_vm0, %v1415_v0  ;;  %s1037_s12 = sshll.u32 %s1825_s22, 3  ;;  %p692_p2 = scmp.eq.s32.totalorder %s1389_s27, 0 }
  0x1e   : > { %s1560_s21 = scalar_lea.vmem %s1786_s3, %s1037_s12  ;;  %s1565_s13 = scalar_lea.vmem %s1787_s4, %s1037_s12 }
  0x1f   : > { %v415_v1 = vld [vmem:[%s1560_s21 + $0x78] sm:$0xff]  ;;  %s1569_s22 = sshll.u32 %s370_s11, 3  ;;  %v414_v3 = vld [vmem:[%s1560_s21 + $0x70] sm:$0xff]  ;;  %v413_v5 = vld [vmem:[%s1560_s21 + $0x68] sm:$0xff]  ;;  %p1683_p3 = pnand %p692_p2, %p691_p1 }
  0x20   : > { %v561_v2 = vld [vmem:[%s1565_s13 + $0x78] sm:$0xff]  ;;  %1118 = vmatpush3.xpose.msk.msra.mxu0 %vm423_vm1, %v415_v1  ;;  %s1577_s14 = scalar_lea.vmem %s1799_s0, %s1569_s22  ;;  %v560_v4 = vld [vmem:[%s1565_s13 + $0x70] sm:$0xff]  ;;  %v559_v6 = vld [vmem:[%s1565_s13 + $0x68] sm:$0xff]  ;;  %s376_s12 = scalar_lea.vmem %s1784_s1, %s1569_s22 }
  0x21   : > { %1153 = vmatpush3.xpose.msk.msra.mxu1 %vm569_vm2, %v561_v2  ;;  %1119 = vmatprep.subr.mxu0 %v1415_v0  ;;  %v412_v7 = vld [vmem:[%s1560_s21 + $0x60] sm:$0xff]  ;;  %v411_v9 = vld [vmem:[%s1560_s21 + $0x58] sm:$0xff]  ;;  %v410_v11 = vld [vmem:[%s1560_s21 + $0x50] sm:$0xff]  ;;  %s380_s0 = scalar_lea.vmem %s1785_s2, %s1569_s22  ;;  %p393_p4 = scmp.lt.s32.totalorder %s1389_s27, 1 }
  0x22   : > { %1154 = vmatprep.subr.mxu1 %v1415_v0  ;;  %v558_v8 = vld [vmem:[%s1565_s13 + $0x60] sm:$0xff]  ;;  %v557_v10 = vld [vmem:[%s1565_s13 + $0x58] sm:$0xff]  ;;  %v556_v12 = vld [vmem:[%s1565_s13 + $0x50] sm:$0xff]  ;;  %s368_s19 = scalar_lea.vmem [#allocation10], %s1549_s23 }
  0x23   : > { %v409_v13 = vld [vmem:[%s1560_s21 + $0x48] sm:$0xff]  ;;  %v408_v15 = vld [vmem:[%s1560_s21 + $0x40] sm:$0xff]  ;;  %v407_v17 = vld [vmem:[%s1560_s21 + $0x38] sm:$0xff] }
  0x24   : > { %1120 = vmatpush3.xpose.msk.msra.mxu0 %vm423_vm1, %v414_v3  ;;  %v555_v14 = vld [vmem:[%s1565_s13 + $0x48] sm:$0xff]  ;;  %v554_v16 = vld [vmem:[%s1565_s13 + $0x40] sm:$0xff]  ;;  %v553_v18 = vld [vmem:[%s1565_s13 + $0x38] sm:$0xff] }
  0x25   : > { %1155 = vmatpush3.xpose.msk.msra.mxu1 %vm569_vm2, %v560_v4  ;;  %1121 = vmatprep.subr.mxu0 %v1415_v0  ;;  %v406_v19 = vld [vmem:[%s1560_s21 + $0x30] sm:$0xff]  ;;  %v405_v21 = vld [vmem:[%s1560_s21 + $0x28] sm:$0xff]  ;;  %v404_v23 = vld [vmem:[%s1560_s21 + $0x20] sm:$0xff] }
  0x26   : > { %1156 = vmatprep.subr.mxu1 %v1415_v0  ;;  %v552_v20 = vld [vmem:[%s1565_s13 + $0x30] sm:$0xff]  ;;  %v551_v22 = vld [vmem:[%s1565_s13 + $0x28] sm:$0xff]  ;;  %v550_v24 = vld [vmem:[%s1565_s13 + $0x20] sm:$0xff] }
  0x27   : > { %v403_v25 = vld [vmem:[%s1560_s21 + $0x18] sm:$0xff]  ;;  %v402_v27 = vld [vmem:[%s1560_s21 + $0x10] sm:$0xff]  ;;  %v401_v29 = vld [vmem:[%s1560_s21 + $0x8] sm:$0xff] }
  0x28   : > { %1122 = vmatpush3.xpose.msk.msra.mxu0 %vm423_vm1, %v413_v5  ;;  %v549_v26 = vld [vmem:[%s1565_s13 + $0x18] sm:$0xff]  ;;  %v548_v28 = vld [vmem:[%s1565_s13 + $0x10] sm:$0xff]  ;;  %v547_v30 = vld [vmem:[%s1565_s13 + $0x8] sm:$0xff] }
  0x29   : > { %1157 = vmatpush3.xpose.msk.msra.mxu1 %vm569_vm2, %v559_v6  ;;  %1123 = vmatprep.subr.mxu0 %v1415_v0  ;;  %v400_v31 = vld [vmem:[%s1560_s21] sm:$0xff]  ;;  %s394_s21 = scalar_select %p393_p4, %s1389_s27, 1 }
  0x2a   : > { %1158 = vmatprep.subr.mxu1 %v1415_v0  ;;  %v546_v32 = vld [vmem:[%s1565_s13] sm:$0xff] }
  0x2b   : > { %v399_v33 = vld [vmem:[%s376_s12] sm:$0xff]  ;;  %s395_s11 = scalar_lea.vmem %s1788_s5, %s394_s21  ;;  %s398_s18 = scalar_lea.vmem %s1789_s6, %s394_s21 }
  0x2c   : > { %1124 = vmatpush3.xpose.msk.msra.mxu0 %vm423_vm1, %v412_v7  ;;  %v545_v34 = vld [vmem:[%s380_s0] sm:$0xff] }
  0x2d   : > { %1159 = vmatpush3.xpose.msk.msra.mxu1 %vm569_vm2, %v558_v8  ;;  %1125 = vmatprep.subr.mxu0 %v1415_v0  ;;  %v1040_v35 = vld [vmem:[%s395_s11] ss:$0 sm:$0xff] }
  0x2e   : > { %1160 = vmatprep.subr.mxu1 %v1415_v0  ;;  %v1058_v36 = vld [vmem:[%s398_s18] ss:$0 sm:$0xff] }
  0x30   : > { %1126 = vmatpush3.xpose.msk.msra.mxu0 %vm423_vm1, %v411_v9 }
  0x31   : > { %1161 = vmatpush3.xpose.msk.msra.mxu1 %vm569_vm2, %v557_v10  ;;  %1127 = vmatprep.subr.mxu0 %v1415_v0 }
  0x32   : > { %1162 = vmatprep.subr.mxu1 %v1415_v0 }
  0x34   : > { %1128 = vmatpush3.xpose.msk.msra.mxu0 %vm423_vm1, %v410_v11 }
  0x35   : > { %1163 = vmatpush3.xpose.msk.msra.mxu1 %vm569_vm2, %v556_v12  ;;  %1129 = vmatprep.subr.mxu0 %v1415_v0 }
  0x36   : > { %1164 = vmatprep.subr.mxu1 %v1415_v0 }
  0x38   : > { %1130 = vmatpush3.xpose.msk.msra.mxu0 %vm423_vm1, %v409_v13 }
  0x39   : > { %1165 = vmatpush3.xpose.msk.msra.mxu1 %vm569_vm2, %v555_v14  ;;  %1131 = vmatprep.subr.mxu0 %v1415_v0 }
  0x3a   : > { %1166 = vmatprep.subr.mxu1 %v1415_v0 }
  0x3c   : > { %1132 = vmatpush3.xpose.msk.msra.mxu0 %vm423_vm1, %v408_v15 }
  0x3d   : > { %1167 = vmatpush3.xpose.msk.msra.mxu1 %vm569_vm2, %v554_v16  ;;  %1133 = vmatprep.subr.mxu0 %v1415_v0 }
  0x3e   : > { %1168 = vmatprep.subr.mxu1 %v1415_v0 }
  0x40   : > { %1134 = vmatpush3.xpose.msk.msra.mxu0 %vm423_vm1, %v407_v17 }
  0x41   : > { %1169 = vmatpush3.xpose.msk.msra.mxu1 %vm569_vm2, %v553_v18  ;;  %1135 = vmatprep.subr.mxu0 %v1415_v0 }
  0x42   : > { %1170 = vmatprep.subr.mxu1 %v1415_v0 }
  0x44   : > { %1136 = vmatpush3.xpose.msk.msra.mxu0 %vm423_vm1, %v406_v19 }
  0x45   : > { %1171 = vmatpush3.xpose.msk.msra.mxu1 %vm569_vm2, %v552_v20  ;;  %1137 = vmatprep.subr.mxu0 %v1415_v0 }
  0x46   : > { %1172 = vmatprep.subr.mxu1 %v1415_v0 }
  0x48   : > { %1138 = vmatpush3.xpose.msk.msra.mxu0 %vm423_vm1, %v405_v21 }
  0x49   : > { %1173 = vmatpush3.xpose.msk.msra.mxu1 %vm569_vm2, %v551_v22  ;;  %1139 = vmatprep.subr.mxu0 %v1415_v0 }
  0x4a   : > { %1174 = vmatprep.subr.mxu1 %v1415_v0 }
  0x4c   : > { %1140 = vmatpush3.xpose.msk.msra.mxu0 %vm423_vm1, %v404_v23 }
  0x4d   : > { %1175 = vmatpush3.xpose.msk.msra.mxu1 %vm569_vm2, %v550_v24  ;;  %1141 = vmatprep.subr.mxu0 %v1415_v0 }
  0x4e   : > { %1176 = vmatprep.subr.mxu1 %v1415_v0 }
  0x50   : > { %1142 = vmatpush3.xpose.msk.msra.mxu0 %vm423_vm1, %v403_v25 }
  0x51   : > { %1177 = vmatpush3.xpose.msk.msra.mxu1 %vm569_vm2, %v549_v26  ;;  %1143 = vmatprep.subr.mxu0 %v1415_v0 }
  0x52   : > { %1178 = vmatprep.subr.mxu1 %v1415_v0 }
  0x54   : > { %1144 = vmatpush3.xpose.msk.msra.mxu0 %vm423_vm1, %v402_v27 }
  0x55   : > { %1179 = vmatpush3.xpose.msk.msra.mxu1 %vm569_vm2, %v548_v28  ;;  %1145 = vmatprep.subr.mxu0 %v1415_v0 }
  0x56   : > { %1180 = vmatprep.subr.mxu1 %v1415_v0 }
  0x58   : > { %1146 = vmatpush3.xpose.msk.msra.mxu0 %vm423_vm1, %v401_v29 }
  0x59   : > { %1181 = vmatpush3.xpose.msk.msra.mxu1 %vm569_vm2, %v547_v30  ;;  %1147 = vmatprep.subr.mxu0 %v1415_v0 }
  0x5a   : > { %1182 = vmatprep.subr.mxu1 %v1415_v0 }
  0x5c   : > { %1148 = vmatpush3.xpose.msk.msra.mxu0 %vm423_vm1, %v400_v31 }
  0x5d   : > { %1183 = vmatpush3.xpose.msk.msra.mxu1 %vm569_vm2, %v546_v32 }
  0x5f   : > { %1150 = vmatmul.mubr.msk.f32.vlgmr.msra.gmra.mxu0 %vm423_vm1, %v399_v33 }
  0x60   : > { %1185 = vmatmul.mubr.msk.f32.vlgmr.msra.gmra.mxu1 %vm569_vm2, %v545_v34 }
 0x11e   : > { %696 = sbr.rel (%p1683_p3) target bundleno = 295 (0x127), region = 52 }
 0x11f   : > { %v541_v37 = vpop.f32.mrf.mxu0 }
 0x120   : > { %v687_v38 = vpop.f32.mrf.mxu1  ;;  %v1695_v39 = vadd.f32 %v1040_v35, %v541_v37 }
 0x121   : > { %v1697_v40 = vadd.f32 %v1058_v36, %v687_v38  ;;  %v1151_v41 = vpop.f32.mrf.mxu0 }
 0x122   : > { %v1186_v42 = vpop.f32.mrf.mxu1 }
 0x123   : > { %vm697_vm3 = vcmask 7168   ;;  %v1417_v43 = vmov -inf   ;;  %v1418_v44 = vmov 0.0  }
 0x124   : > { %698 = vst.msk [vmem:[#allocation2] sm:$0xff] %vm697_vm3, %v1417_v43  ;;  %700 = vst.msk [vmem:[#allocation4] sm:$0xff] %vm697_vm3, %v1417_v43 }
 0x125   : > { %699 = vst.msk [vmem:[#allocation3] sm:$0xff] %vm697_vm3, %v1418_v44  ;;  %701 = vst.msk [vmem:[#allocation5] sm:$0xff] %vm697_vm3, %v1418_v44 }
 0x126   : > { %704 = vst.msk [vmem:[#allocation8] sm:$0xff] %vm697_vm3, %v1418_v44  ;;  %705 = vst.msk [vmem:[#allocation9] sm:$0xff] %vm697_vm3, %v1418_v44 }
 0x127 PF: > { %p1076_p5 = scmp.ne.s32.totalorder %s1393_s28, 0 }
 0x128   : > { %s1077_s13 = sshll.u32 (!%p1076_p5), %s1389_s27, 7 }
 0x129   : > { %708 = sbr.rel (%p1076_p5) target bundleno = 733 (0x2dd), region = 56 }
 0x12e   : > { %710 = vmax.xlane.f32.xlu0 %v1695_v39  ;;  %v1419_v45 = vmov 0   ;;  %v759_v46 = vld [vmem:[%s1577_s14] sm:$0xff]  ;;  %vm729_vm4 = vcmask 7168   ;;  %v732_v50 = vld [vmem:[#allocation4] sm:$0xff]  ;;  %v755_v61 = vlaneseq  ;;  %v757_v63 = vstv %s1077_s13  ;;  %v713_v8 = vld [vmem:[#allocation3] sm:$0xff] }
 0x12f   : > { %1284 = vset.pattern.permute.xlu1 %v1419_v45  ;;  %1285 = vset.pattern.permute.xlu0 %v1419_v45  ;;  %v709_v47 = vld [vmem:[#allocation2] sm:$0xff]  ;;  %v736_v12 = vld [vmem:[#allocation5] sm:$0xff] }
 0x130   : > { %v756_v62 = vand.u32 127, %v755_v61  ;;  %v760_v17 = vld [vmem:[#allocation8] sm:$0xff] }
 0x132   : > { %733 = vmax.xlane.f32.xlu0 %v1697_v40  ;;  %v758_v0 = vadd.s32 %v757_v63, %v756_v62 }
 0x148   : > { %762 = vperm.xlu0 %1285, %v759_v46  }
 0x1b7   : > { %v711_v48 = vpop.xlane.xlu0 %710 }
 0x1b8   : > { %v712_v49 = vmax.f32 %v709_v47, %v711_v48 }
 0x1ba   : > { %v714_v51 = vsub.f32 %v709_v47, %v712_v49  ;;  %731 = vst.msk [vmem:[#allocation2] sm:$0xff] %vm729_vm4, %v712_v49  ;;  %720 = vperm.xlu1 %1284, %v712_v49  }
 0x1bb   : > { %v734_v52 = vpop.xlane.xlu0 %733 }
 0x1bc   : > { %v735_v53 = vmax.f32 %v732_v50, %v734_v52  ;;  %v715_v5 = vmul.f32 1.442695, %v714_v51 }
 0x1be   : > { %v737_v54 = vsub.f32 %v732_v50, %v735_v53  ;;  %753 = vst.msk [vmem:[#allocation4] sm:$0xff] %vm729_vm4, %v735_v53  ;;  %743 = vperm.xlu1 %1284, %v735_v53  }
 0x1c0   : > { %v738_v6 = vmul.f32 1.442695, %v737_v54 }
 0x1c3   : > { %v763_v2 = vpop.permute.xlu0 %762 }
 0x1c4   : > { %vm764_vm5 = vcmp.eq.s32.totalorder %v758_v0, %v763_v2 }
 0x1c5   : > { %v765_v4 = vsel %vm764_vm5, %v1695_v39, 0.0 }
 0x235   : > { %v721_v55 = vpop.permute.xlu1 %720 }
 0x236   : > { %v723_v56 = vsub.f32 %v1695_v39, %v721_v55 }
 0x238   : > { %v724_v57 = vmul.f32 1.442695, %v723_v56 }
 0x239   : > { %v744_v58 = vpop.permute.xlu1 %743 }
 0x23a   : > { %1286 = vpow2.f32 %v724_v57  ;;  %v746_v59 = vsub.f32 %v1697_v40, %v744_v58 }
 0x23c   : > { %v747_v60 = vmul.f32 1.442695, %v746_v59 }
 0x23e   : > { %1288 = vpow2.f32 %v747_v60 }
 0x23f   : > { %1290 = vpow2.f32 %v715_v5 }
 0x240   : > { %1292 = vpow2.f32 %v738_v6 }
 0x247   : > { %v1287_v1 = vpop.eup %1286 }
 0x248   : > { %726 = vadd.xlane.f32.xlu1 %v1287_v1 }
 0x24b   : > { %v1289_v3 = vpop.eup %1288 }
 0x24c   : > { %749 = vadd.xlane.f32.xlu1 %v1289_v3  ;;  %v1291_v7 = vpop.eup %1290 }
 0x24d   : > { %v717_v9 = vmul.f32 %v1291_v7, %v713_v8  ;;  %v1293_v10 = vpop.eup %1292 }
 0x24e   : > { %v740_v14 = vmul.f32 %v1293_v10, %v736_v12 }
 0x250   : > { %766 = vadd.xlane.f32.xlu1 %v765_v4 }
 0x2d1   : > { %v727_v11 = vpop.xlane.xlu1 %726 }
 0x2d2   : > { %v728_v13 = vadd.f32 %v727_v11, %v717_v9 }
 0x2d4   : > { %730 = vst.msk [vmem:[#allocation3] sm:$0xff] %vm729_vm4, %v728_v13 }
 0x2d5   : > { %v750_v15 = vpop.xlane.xlu1 %749 }
 0x2d6   : > { %v751_v16 = vadd.f32 %v750_v15, %v740_v14 }
 0x2d8   : > { %752 = vst.msk [vmem:[#allocation5] sm:$0xff] %vm729_vm4, %v751_v16 }
 0x2d9   : > { %v767_v18 = vpop.xlane.xlu1 %766 }
 0x2da   : > { %v768_v19 = vadd.f32 %v767_v18, %v760_v17 }
 0x2dc   : > { %769 = vst.msk [vmem:[#allocation8] sm:$0xff] %vm729_vm4, %v768_v19 }
 0x2dd PF: > { %p770_p7 = scmp.eq.s32.totalorder %s1393_s28, 1 }
 0x2df   : > { %p771_p9 = pnand %p770_p7, %p692_p2 }
 0x2e1   : > { %774 = sbr.rel (%p771_p9) target bundleno = 763 (0x2fb), region = 60 }
 0x2e6   : > { %v776_v20 = vld [vmem:[#allocation3] sm:$0xff]  ;;  %v783_v21 = vld [vmem:[#allocation5] sm:$0xff]  ;;  %v775_v23 = vld [vmem:[#allocation2] sm:$0xff]  ;;  %vm780_vm6 = vcmask 7168  }
 0x2e7   : > { %1294 = vlog2.f32 %v776_v20  ;;  %v782_v26 = vld [vmem:[#allocation4] sm:$0xff] }
 0x2e8   : > { %1296 = vlog2.f32 %v783_v21 }
 0x2f4   : > { %v1295_v22 = vpop.eup %1294 }
 0x2f5   : > { %v1297_v24 = vpop.eup %1296  ;;  %v778_v25 = vmul.f32 0.6931472, %v1295_v22 }
 0x2f6   : > { %v785_v27 = vmul.f32 0.6931472, %v1297_v24 }
 0x2f7   : > { %v779_v28 = vadd.f32 %v778_v25, %v775_v23 }
 0x2f8   : > { %v786_v29 = vadd.f32 %v785_v27, %v782_v26 }
 0x2f9   : > { %781 = vst.msk [vmem:[#allocation2] sm:$0xff] %vm780_vm6, %v779_v28 }
 0x2fa   : > { %787 = vst.msk [vmem:[#allocation4] sm:$0xff] %vm780_vm6, %v786_v29 }
 0x2fb PF: > { %p1078_p10 = scmp.ne.s32.totalorder %s1393_s28, 1 }
 0x2fd   : > { %790 = sbr.rel (%p1078_p10) target bundleno = 1086 (0x43e), region = 64 }
 0x302   : > { %v791_v30 = vld [vmem:[#allocation2] sm:$0xff]  ;;  %v1420_v31 = vmov 0   ;;  %v798_v32 = vld [vmem:[#allocation4] sm:$0xff]  ;;  %v823_v53 = vld [vmem:[#allocation9] sm:$0xff]  ;;  %vm827_vm9 = vcmask 7168  }
 0x303   : > { %1298 = vset.pattern.permute.xlu0 %v1420_v31 }
 0x304   : > { %794 = vperm.xlu0 %1298, %v791_v30  }
 0x308   : > { %801 = vperm.xlu0 %1298, %v798_v32  }
 0x37f   : > { %v795_v33 = vpop.permute.xlu0 %794 }
 0x380   : > { %v797_v34 = vsub.f32 %v1695_v39, %v795_v33 }
 0x382   : > { %v805_v35 = vmul.f32 1.442695, %v797_v34 }
 0x383   : > { %v802_v36 = vpop.permute.xlu0 %801 }
 0x384   : > { %v804_v37 = vsub.f32 %v1697_v40, %v802_v36  ;;  %1299 = vpow2.f32 %v805_v35 }
 0x386   : > { %v807_v38 = vmul.f32 1.442695, %v804_v37 }
 0x388   : > { %1301 = vpow2.f32 %v807_v38 }
 0x391   : > { %v1300_v41 = vpop.eup %1299 }
 0x392   : > { %v809_v43 = vmul.f32 0.5, %v1300_v41  ;;  %vm814_vm7 = vcmp.gt.f32.partialorder %v1300_v41, 0.0 }
 0x395   : > { %v1302_v42 = vpop.eup %1301 }
 0x396   : > { %v810_v44 = vmul.f32 0.5, %v1302_v42  ;;  %vm818_vm8 = vcmp.gt.f32.partialorder %v1302_v42, 0.0 }
 0x398   : > { %v811_v45 = vadd.f32 %v810_v44, %v809_v43 }
 0x39a   : > { %1303 = vlog2.f32 %v811_v45 }
 0x3a7   : > { %v1304_v46 = vpop.eup %1303 }
 0x3a8   : > { %v813_v47 = vmul.f32 0.6931472, %v1304_v46 }
 0x3aa   : > { %v819_v48 = vsub.f32 %v804_v37, %v813_v47  ;;  %v815_v49 = vsub.f32 %v797_v34, %v813_v47 }
 0x3ac   : > { %v816_v50 = vmul.f32 %v815_v49, %v809_v43  ;;  %v820_v51 = vmul.f32 %v819_v48, %v810_v44 }
 0x3ae   : > { %v817_v39 = vsel %vm814_vm7, %v816_v50, 0.0  ;;  %v821_v52 = vsel %vm818_vm8, %v820_v51, 0.0 }
 0x3af   : > { %v822_v40 = vadd.f32 %v821_v52, %v817_v39 }
 0x3b1   : > { %824 = vadd.xlane.f32.xlu1 %v822_v40 }
 0x43a   : > { %v825_v54 = vpop.xlane.xlu1 %824 }
 0x43b   : > { %v826_v55 = vadd.f32 %v825_v54, %v823_v53 }
 0x43d   : > { %828 = vst.msk [vmem:[#allocation9] sm:$0xff] %vm827_vm9, %v826_v55 }
 0x43e PF: > { %p829_p11 = scmp.eq.s32.totalorder %s1389_s27, 1 }
 0x440   : > { %p830_p12 = pnand %p829_p11, %p770_p7 }
 0x442   : > { %833 = sbr.rel (%p830_p12) target bundleno = 1310 (0x51e), region = 68 }
 0x447   : > { %v834_v56 = vld [vmem:[%s1577_s14] sm:$0xff]  ;;  %vm841_vm11 = vcmask 7168   ;;  %v840_v61 = vld [vmem:[#allocation9] sm:$0xff]  ;;  %v862_v14 = vlaneseq }
 0x448   : > { %v836_v57 = vld [vmem:[#allocation2] sm:$0xff]  ;;  %vm835_vm10 = vcmp.ne.s32.totalorder %v834_v56, 4294967196  ;;  %v852_v63 = vsel %vm841_vm11, %v840_v61, 0.0 }
 0x449   : > { %v837_v58 = vld [vmem:[#allocation8] sm:$0xff]  ;;  %v863_v15 = vand.u32 127, %v862_v14 }
 0x44a   : > { %v838_v59 = vsub.f32 %v836_v57, %v837_v58 }
 0x44b   : > { %vm865_vm12 = vcmp.eq.s32.totalorder %v863_v15, 1  ;;  %vm864_vm13 = vcmp.eq.s32.totalorder %v863_v15, 0 }
 0x44c   : > { %v839_v60 = vsel %vm835_vm10, %v838_v59, 0.0 }
 0x44d   : > { %v842_v62 = vsel %vm841_vm11, %v839_v60, 0.0 }
 0x44e   : > { %843 = vadd.xlane.f32.xlu0 %v842_v62 }
 0x452   : > { %853 = vadd.xlane.f32.xlu0 %v852_v63 }
 0x4d7   : > { %v844_v0 = vpop.xlane.xlu0 %843 }
 0x4d8   : > { %v845_v1 = vrot.slane %v844_v0, 4 }
 0x4da   : > { %v846_v2 = vadd.f32 %v845_v1, %v844_v0 }
 0x4db   : > { %v854_v3 = vpop.xlane.xlu0 %853 }
 0x4dc   : > { %v847_v4 = vrot.slane %v846_v2, 2  ;;  %v855_v5 = vrot.slane %v854_v3, 4 }
 0x4de   : > { %v856_v6 = vadd.f32 %v855_v5, %v854_v3  ;;  %v848_v7 = vadd.f32 %v847_v4, %v846_v2 }
 0x4e0   : > { %v857_v8 = vrot.slane %v856_v6, 2  ;;  %v849_v9 = vrot.slane %v848_v7, 1 }
 0x4e2   : > { %v858_v10 = vadd.f32 %v857_v8, %v856_v6  ;;  %v850_v11 = vadd.f32 %v849_v9, %v848_v7 }
 0x4e4   : > { %1187 = vpush %v850_v11  ;;  %v859_v12 = vrot.slane %v858_v10, 1 }
 0x4e6   : > { %v860_v13 = vadd.f32 %v859_v12, %v858_v10 }
 0x4e8   : > { %1189 = vpush %v860_v13 }
 0x515   : > { %s1188_s27 = spop %1187 }
 0x516   : > { %v868_v17 = vstv %s1188_s27 }
 0x519   : > { %s1190_s28 = spop %1189 }
 0x51a   : > { %v866_v16 = vstv %s1190_s28 }
 0x51b   : > { %v867_v18 = vsel %vm865_vm12, %v866_v16, 0.0 }
 0x51c   : > { %v869_v19 = vsel %vm864_vm13, %v868_v17, %v867_v18 }
 0x51d   : > { %870 = vst [vmem:[%s368_s19] sm:$0xff] %v869_v19 }
 0x51e PF: > { %s1080_s14 = sshll.u32 %s1397_s29, 7  ;;  %s885_s11 = sshll.u32 %s368_s19, 4  ;;  %s886_s11 = int_to_ptr.vmem [resolvable:$true] %s885_s11 }
 0x51f   : > { %s883_s15 = scalar_lea.hbm %s1790_s7, %s1080_s14  ;;  %s1801_s12 = sand.u32 1, %s1381_s25  }
 0x520   : > { %s872_s0 = scalar_lea.sflag [#allocation11], %s1801_s12  ;;  %s1305_s18 = scalar_lea.vmem %s886_s11, 128 }
 0x521   : > { %p1306_p13 = scmp.ne.s32.totalorder %s886_s11, %s1305_s18  ;;  %s1421_s13 = smov [#allocation10]  }
 0x522   : > { %s1309_s27 = sshll.u32 %s1421_s13, 4  ;;  %s1310_s27 = int_to_ptr.vmem [resolvable:$false] %s1309_s27 }
 0x523   : > { %p1307_p0 = pnand %p1306_p13, %p1524_p6  ;;  %s1311_s28 = scalar_lea.vmem %s1310_s27, 256 }
 0x524   : > { %p1312_p2 = scmp.lt.s32.totalorder %s886_s11, %s1310_s27  ;;  %p1313_p3 = scmp.lt.s32.totalorder %s1311_s28, %s1305_s18 }
 0x525   : > { %p1308_p1 = pneg %p1307_p0 }
 0x526   : > { %p1314_p4 = por %p1313_p3, %p1312_p2 }
 0x528   : > { %p1315_p5 = pnand %p1314_p4, %p1308_p1 }
 0x52a   : > { %1318 = shalt.err (!%p1315_p5)
}
 0x52b   : > { %s1319_s29 = scalar_lea.hbm %s883_s15, 128  ;;  %s1323_s14 = scalar_lea.hbm %s1790_s7, 256 }
 0x52c   : > { %p1320_p7 = scmp.ne.s32.totalorder %s883_s15, %s1319_s29  ;;  %p1324_p11 = scmp.lt.s32.totalorder %s883_s15, %s1790_s7 }
 0x52d   : > { %p1325_p12 = scmp.lt.s32.totalorder %s1323_s14, %s1319_s29 }
 0x52e   : > { %p1321_p9 = pnand %p1320_p7, %p1524_p6 }
 0x52f   : > { %p1326_p13 = por %p1325_p12, %p1324_p11 }
 0x530   : > { %p1322_p10 = pneg %p1321_p9 }
 0x532   : > { %p1327_p0 = pnand %p1326_p13, %p1322_p10 }
 0x534   : > { %1330 = shalt.err (!%p1327_p0)
}
 0x535   : > { %1191 = dma.vmem_to_hbm [thread:$0]  (%p1524_p6), %s886_s11, 128, %s883_s15, %s872_s0  }
 0x536 PF: > { %p1197_p1 = scmp.ge.s32.totalorder %s1413_s10, 2  ;;  %s897_s12 = sand.u32 1, %s1377_s24  }
 0x537   : > { %s898_s18 = scalar_lea.sflag [#allocation11], %s897_s12 }
 0x538   : > { %p1194_p2 = pnand %p1197_p1, %p1532_p8 }
 0x53a   : > { %p1195_p3 = pneg %p1194_p2 }
 0x53c   : > { %1372 = dma.done.wait (%p1195_p3), %s898_s18, 128  }
 0x53d   : > { %1374 = vsyncadd (%p1195_p3), %s898_s18, 4294967168  ;;  %s20_s10 = sadd.s32 1, %s1413_s10   ;;  %s1802_s16 = sld [smem:[#allocation13_spill]] }
 0x53e   : > { %p17_p4 = scmp.ge.s32.totalorder %s20_s10, 10   ;;  %s1803_s15 = sld [smem:[#allocation14_spill]] }
 0x53f   : > { %s1804_s11 = sld [smem:[#allocation15_spill]]  ;;  %s1805_s24 = smov %s1381_s25 }
 0x540   : > { %s1806_s25 = smov %s1385_s26  ;;  %s1807_s26 = smov %s1543_s20 }
 0x541   : > { %s1808_s27 = smov %s1401_s30  ;;  %s1809_s28 = smov %s1405_s8 }
 0x542   : > { %s1810_s29 = smov %s1409_s9  ;;  %19 = sbr.rel (!%p17_p4) target bundleno = 8 (0x8), region = 121 }
 0x543   : > { %s1811_s30 = smov %s1802_s16 }
 0x544   : > { %s1812_s8 = smov %s1803_s15 }
 0x545   : > { %s1813_s9 = smov %s1804_s11 }
 0x547   :  { %903 = vsyncpa [#allocation11], 1 }
 0x548   :  { %905 = vsyncpa [#allocation11 + $0x1], 1 }

</bundles_post_ra>
